<compile_context>
chip_gen: v7x
topology: tpu7x:2x2x1
jax: 0.10.0
libtpu: 0.0.40
codegen_flags: <defaults>
</compile_context>

<pallas_src>
import functools

import jax
import jax.numpy as jnp
from jax import lax
from jax.experimental import pallas as pl
from jax.experimental.pallas import tpu as pltpu


def _rnn_rollout_kernel(x_ref, h0_ref,
                        w1_ref, b1_ref,
                        wih_ref, whh_ref, bih_ref, bhh_ref,
                        w2_ref, b2_ref,
                        q_ref, h_ref,
                        *, hidden_dim, continuous, chunk, t_total, needs_mask,
                        unroll):
    """`chunk` GRU timesteps per grid iteration; h_ref is the VMEM-resident carry."""
    H = hidden_dim

    # Seed the resident hidden-state block from the kernel input at chunk 0.
    @pl.when(pl.program_id(0) == 0)
    def _():
        h_ref[...] = h0_ref[...]

    # Hoist VMEM-resident weights / biases out of the time loop.
    w1 = w1_ref[...]
    b1 = b1_ref[...]
    wih = wih_ref[...]
    whh = whh_ref[...]
    bih = bih_ref[...]
    bhh = bhh_ref[...]
    w2 = w2_ref[...]
    b2 = b2_ref[...]
    wdt = w1.dtype               # matmul operand dtype (f32 or bf16)

    t0 = pl.program_id(0) * chunk   # global timestep of this chunk's first row

    def step(i, h):
        x = x_ref[i]                                              # (B, D_in)

        # ---- fc1 + ReLU ----------------------------------------------------
        z1 = jnp.dot(x.astype(wdt), w1,
                     preferred_element_type=jnp.float32) + b1
        xh = jnp.maximum(z1, 0.0)                                 # (B, H) f32

        # ---- GRUCell (PyTorch semantics): 2 packed matmuls ------------------
        # gi = x W_ih + b_ih ; gh = h W_hh + b_hh ; slabs [r | z | n], width H
        gi = jnp.dot(xh.astype(wdt), wih,
                     preferred_element_type=jnp.float32) + bih    # (B, 3H)
        gh = jnp.dot(h.astype(wdt), whh,
                     preferred_element_type=jnp.float32) + bhh    # (B, 3H)

        r = jax.nn.sigmoid(gi[:, 0:H] + gh[:, 0:H])
        z = jax.nn.sigmoid(gi[:, H:2 * H] + gh[:, H:2 * H])
        n = jnp.tanh(gi[:, 2 * H:3 * H] + r * gh[:, 2 * H:3 * H])
        h_new = (1.0 - z) * n + z * h                             # (B, H) f32

        # ---- fc2 (+ optional tanh for continuous action space) -------------
        q = jnp.dot(h_new.astype(wdt), w2,
                    preferred_element_type=jnp.float32) + b2
        if continuous:
            q = jnp.tanh(q)
        q_ref[i] = q.astype(q_ref.dtype)          # streamed per-chunk output

        if needs_mask:
            # Padded (t >= T) steps must not advance the recurrence.
            h_new = jnp.where(t0 + i < t_total, h_new, h)
        return h_new

    h_final = lax.fori_loop(0, chunk, step, h_ref[...], unroll=unroll)
    h_ref[...] = h_final.astype(h_ref.dtype)       # resident carry, one write


def rnn_agent_rollout(params, inputs_seq, hidden_state, *,
                      continuous=False, matmul_dtype=jnp.float32,
                      time_chunk=8):
    """Run T GRU steps in ONE pallas_call.

    inputs_seq: (T, B, D_in); hidden_state: (..., H) reshaped to (B, H).
    Returns (q_seq (T, B, A), h_final (B, H)).  Intended to be jit-compiled.
    """
    T, B, D = inputs_seq.shape
    H = params["w_hh"].shape[0]
    A = params["w2"].shape[1]

    # Pad batch to a full f32 sublane multiple and fc2 output to a lane-dense
    # 128-wide slab (zero columns); both sliced back before returning.
    B_pad = max(8, ((B + 7) // 8) * 8)
    A_pad = max(128, ((A + 127) // 128) * 128)

    # Chunk the time axis: per-grid-step overhead amortized over `chunk` steps.
    chunk = max(1, min(time_chunk, T))
    n_chunks = (T + chunk - 1) // chunk
    T_pad = n_chunks * chunk
    needs_mask = (T_pad != T)

    x = inputs_seq
    h0 = hidden_state.reshape(-1, H).astype(jnp.float32)
    if T_pad != T or B_pad != B:
        x = jnp.pad(x, ((0, T_pad - T), (0, B_pad - B), (0, 0)))
    if B_pad != B:
        h0 = jnp.pad(h0, ((0, B_pad - B), (0, 0)))
    w2, b2 = params["w2"], params["b2"]
    if A_pad != A:
        w2 = jnp.pad(w2, ((0, 0), (0, A_pad - A)))
        b2 = jnp.pad(b2, ((0, 0), (0, A_pad - A)))

    # Optional low-precision MXU operands (v6e / v7x): weights stored bf16,
    # activations cast in-kernel; accumulation and gate math stay f32.
    w1 = params["w1"].astype(matmul_dtype)
    w_ih = params["w_ih"].astype(matmul_dtype)
    w_hh = params["w_hh"].astype(matmul_dtype)
    w2 = w2.astype(matmul_dtype)

    const2 = lambda c: (0, 0)   # weights / biases / hidden: VMEM-resident
    kernel = functools.partial(_rnn_rollout_kernel,
                               hidden_dim=H, continuous=continuous,
                               chunk=chunk, t_total=T, needs_mask=needs_mask,
                               unroll=True)

    q_pad, h_pad = pl.pallas_call(
        kernel,
        out_shape=(jax.ShapeDtypeStruct((T_pad, B_pad, A_pad), jnp.float32),
                   jax.ShapeDtypeStruct((B_pad, H), jnp.float32)),
        grid_spec=pltpu.PrefetchScalarGridSpec(
            num_scalar_prefetch=0,
            grid=(n_chunks,),
            in_specs=[
                pl.BlockSpec((chunk, B_pad, D), lambda c: (c, 0, 0)),  # x chunk (streamed)
                pl.BlockSpec((B_pad, H), const2),                      # h0 (once)
                pl.BlockSpec((D, H), const2),                          # w1
                pl.BlockSpec((1, H), const2),                          # b1
                pl.BlockSpec((H, 3 * H), const2),                      # w_ih
                pl.BlockSpec((H, 3 * H), const2),                      # w_hh
                pl.BlockSpec((1, 3 * H), const2),                      # b_ih
                pl.BlockSpec((1, 3 * H), const2),                      # b_hh
                pl.BlockSpec((H, A_pad), const2),                      # w2
                pl.BlockSpec((1, A_pad), const2),                      # b2
            ],
            out_specs=(
                pl.BlockSpec((chunk, B_pad, A_pad), lambda c: (c, 0, 0)),  # q chunk
                pl.BlockSpec((B_pad, H), const2),                          # h carry (resident)
            ),
        ),
        input_output_aliases={1: 1},   # donate h0 buffer to h_final
        compiler_params=pltpu.CompilerParams(
            dimension_semantics=("arbitrary",)),   # recurrence => sequential axis
    )(x, h0, w1, params["b1"], w_ih, w_hh, params["b_ih"], params["b_hh"],
      w2, b2)

    return q_pad[:T, :B, :A], h_pad[:B]


def rnn_agent_forward(params, inputs, hidden_state, *,
                      continuous=False, matmul_dtype=jnp.float32):
    """Mirrors RNNAgent.forward: one step, inputs (B, D_in) -> (q, h)."""
    q_seq, h = rnn_agent_rollout(params, inputs[None], hidden_state,
                                 continuous=continuous,
                                 matmul_dtype=matmul_dtype, time_chunk=1)
    return q_seq[0], h


def init_params(key, input_dim, hidden_dim, n_actions):
    """Deterministic, PyTorch-style uniform(-1/sqrt(fan_in), 1/sqrt(fan_in)) init."""
    ks = jax.random.split(key, 8)

    def unif(k, shape, fan_in):
        bound = 1.0 / jnp.sqrt(jnp.asarray(fan_in, jnp.float32))
        return jax.random.uniform(k, shape, jnp.float32, -bound, bound)

    H = hidden_dim
    return {
        # fc1: Linear(input_dim, H)   -- stored transposed: (in, out)
        "w1":   unif(ks[0], (input_dim, H), input_dim),
        "b1":   unif(ks[1], (1, H), input_dim),
        # GRUCell(H, H): packed [r|z|n] along the output axis, stored (in, 3H)
        "w_ih": unif(ks[2], (H, 3 * H), H),
        "w_hh": unif(ks[3], (H, 3 * H), H),
        "b_ih": unif(ks[4], (1, 3 * H), H),
        "b_hh": unif(ks[5], (1, 3 * H), H),
        # fc2: Linear(H, n_actions)
        "w2":   unif(ks[6], (H, n_actions), H),
        "b2":   unif(ks[7], (1, n_actions), H),
    }


def reference_forward(params, inputs, hidden_state, *, continuous=False):
    """Pure-JAX reference (mirrors PyTorch RNNAgent.forward)."""
    H = params["w_hh"].shape[0]
    x = jnp.maximum(inputs @ params["w1"] + params["b1"], 0.0)
    h = hidden_state.reshape(-1, H)
    gi = x @ params["w_ih"] + params["b_ih"]
    gh = h @ params["w_hh"] + params["b_hh"]
    i_r, i_z, i_n = gi[:, :H], gi[:, H:2 * H], gi[:, 2 * H:]
    h_r, h_z, h_n = gh[:, :H], gh[:, H:2 * H], gh[:, 2 * H:]
    r = jax.nn.sigmoid(i_r + h_r)
    z = jax.nn.sigmoid(i_z + h_z)
    n = jnp.tanh(i_n + r * h_n)
    h_new = (1.0 - z) * n + z * h
    q = h_new @ params["w2"] + params["b2"]
    if continuous:
        q = jnp.tanh(q)
    return q, h_new


def reference_rollout(params, inputs_seq, hidden_state, *, continuous=False):
    """Pure-JAX multi-step reference (scan of reference_forward)."""
    H = params["w_hh"].shape[0]

    def step(h, x):
        q, h_new = reference_forward(params, x, h, continuous=continuous)
        return h_new, q

    h_final, qs = jax.lax.scan(step, hidden_state.reshape(-1, H), inputs_seq)
    return qs, h_final


if __name__ == "__main__":
    # Small shapes consistent with the module: obs dim 32, RNN_HIDDEN_DIM 32,
    # N_ACTIONS 8, batch 4, rollout length 8, ACTION_SPACE='discrete'.
    INPUT_DIM, HIDDEN_DIM, N_ACTIONS, BATCH, SEQ = 32, 32, 8, 4, 8
    CONTINUOUS = False  # args.ACTION_SPACE == 'continuous' would apply tanh

    root = jax.random.PRNGKey(0)
    k_params, k_x, k_h, k_xs, k_xs2 = jax.random.split(root, 5)

    params = init_params(k_params, INPUT_DIM, HIDDEN_DIM, N_ACTIONS)
    inputs = jax.random.normal(k_x, (BATCH, INPUT_DIM), jnp.float32)
    hidden = jax.random.normal(k_h, (BATCH, HIDDEN_DIM), jnp.float32)
    x_seq = jax.random.normal(k_xs, (SEQ, BATCH, INPUT_DIM), jnp.float32)

    # ---- single step (mirrors RNNAgent.forward) ----------------------------
    step_fn = jax.jit(functools.partial(rnn_agent_forward, continuous=CONTINUOUS))
    q, h = step_fn(params, inputs, hidden)
    q = jax.block_until_ready(q)
    h = jax.block_until_ready(h)
    q_ref, h_ref = reference_forward(params, inputs, hidden, continuous=CONTINUOUS)
    assert q.shape == (BATCH, N_ACTIONS) and h.shape == (BATCH, HIDDEN_DIM)
    assert jnp.allclose(q, q_ref, atol=1e-4, rtol=1e-4)
    assert jnp.allclose(h, h_ref, atol=1e-4, rtol=1e-4)

    # ---- full rollout: T steps, ONE kernel launch, weights loaded once -----
    roll_fn = jax.jit(functools.partial(rnn_agent_rollout, continuous=CONTINUOUS))
    q_seq, h_T = roll_fn(params, x_seq, hidden)
    q_seq = jax.block_until_ready(q_seq)
    h_T = jax.block_until_ready(h_T)
    q_seq_ref, h_T_ref = reference_rollout(params, x_seq, hidden,
                                           continuous=CONTINUOUS)
    assert q_seq.shape == (SEQ, BATCH, N_ACTIONS) and h_T.shape == (BATCH, HIDDEN_DIM)
    assert jnp.allclose(q_seq, q_seq_ref, atol=1e-4, rtol=1e-4)
    assert jnp.allclose(h_T, h_T_ref, atol=1e-4, rtol=1e-4)

    # ---- ragged T (T % chunk != 0): exercises the in-kernel mask path ------
    SEQ2 = 11
    x_seq2 = jax.random.normal(k_xs2, (SEQ2, BATCH, INPUT_DIM), jnp.float32)
    roll_ragged = jax.jit(functools.partial(rnn_agent_rollout,
                                            continuous=CONTINUOUS, time_chunk=4))
    q_seq2, h_T2 = roll_ragged(params, x_seq2, hidden)
    q_seq2 = jax.block_until_ready(q_seq2)
    h_T2 = jax.block_until_ready(h_T2)
    q_seq2_ref, h_T2_ref = reference_rollout(params, x_seq2, hidden,
                                             continuous=CONTINUOUS)
    assert q_seq2.shape == (SEQ2, BATCH, N_ACTIONS)
    assert jnp.allclose(q_seq2, q_seq2_ref, atol=1e-4, rtol=1e-4)
    assert jnp.allclose(h_T2, h_T2_ref, atol=1e-4, rtol=1e-4)

    # ---- bf16 MXU-operand path (v6e / v7x); accumulation stays f32 ----------
    roll_bf16 = jax.jit(functools.partial(rnn_agent_rollout,
                                          continuous=CONTINUOUS,
                                          matmul_dtype=jnp.bfloat16))
    q_bf, h_bf = roll_bf16(params, x_seq, hidden)
    q_bf = jax.block_until_ready(q_bf)
    assert q_bf.shape == q_seq.shape
    assert bool(jnp.all(jnp.isfinite(q_bf))) and bool(jnp.all(jnp.isfinite(h_bf)))

    print("KERNEL_OK")
</pallas_src>

<mosaic_0001>
module attributes {stable_mosaic.version = 11 : i64} {
  func.func @_rnn_rollout_kernel(%arg0: i32, %arg1: memref<1x8x32xf32, #tpu.memory_space<vmem>>, %arg2: memref<8x32xf32, #tpu.memory_space<vmem>>, %arg3: memref<32x32xf32, #tpu.memory_space<vmem>>, %arg4: memref<1x32xf32, #tpu.memory_space<vmem>>, %arg5: memref<32x96xf32, #tpu.memory_space<vmem>>, %arg6: memref<32x96xf32, #tpu.memory_space<vmem>>, %arg7: memref<1x96xf32, #tpu.memory_space<vmem>>, %arg8: memref<1x96xf32, #tpu.memory_space<vmem>>, %arg9: memref<32x128xf32, #tpu.memory_space<vmem>>, %arg10: memref<1x128xf32, #tpu.memory_space<vmem>>, %arg11: memref<1x8x128xf32, #tpu.memory_space<vmem>>, %arg12: memref<8x32xf32, #tpu.memory_space<vmem>>) attributes {dimension_semantics = [#tpu.dimension_semantics<arbitrary>], iteration_bounds = array<i64: 1>, scalar_prefetch = 0 : i64, scratch_operands = 0 : i64, tpu.core_type = #tpu.core_type<tc>, window_params = [{transform_indices = @transform_0, window_bounds = array<i64: 1, 8, 32>}, {pipeline_mode = #tpu.pipeline_mode<synchronous>, transform_indices = @transform_1, window_bounds = array<i64: 8, 32>}, {pipeline_mode = #tpu.pipeline_mode<synchronous>, transform_indices = @transform_2, window_bounds = array<i64: 32, 32>}, {pipeline_mode = #tpu.pipeline_mode<synchronous>, transform_indices = @transform_3, window_bounds = array<i64: 1, 32>}, {pipeline_mode = #tpu.pipeline_mode<synchronous>, transform_indices = @transform_4, window_bounds = array<i64: 32, 96>}, {pipeline_mode = #tpu.pipeline_mode<synchronous>, transform_indices = @transform_5, window_bounds = array<i64: 32, 96>}, {pipeline_mode = #tpu.pipeline_mode<synchronous>, transform_indices = @transform_6, window_bounds = array<i64: 1, 96>}, {pipeline_mode = #tpu.pipeline_mode<synchronous>, transform_indices = @transform_7, window_bounds = array<i64: 1, 96>}, {pipeline_mode = #tpu.pipeline_mode<synchronous>, transform_indices = @transform_8, window_bounds = array<i64: 32, 128>}, {pipeline_mode = #tpu.pipeline_mode<synchronous>, transform_indices = @transform_9, window_bounds = array<i64: 1, 128>}, {transform_indices = @transform_10, window_bounds = array<i64: 1, 8, 128>}, {pipeline_mode = #tpu.pipeline_mode<synchronous>, transform_indices = @transform_11, window_bounds = array<i64: 8, 32>}]} {
    %c0_i32 = arith.constant 0 : i32
    %0 = arith.cmpi eq, %arg0, %c0_i32 : i32
    %1 = arith.extui %0 : i1 to i32
    %c0_i32_0 = arith.constant 0 : i32
    %2 = arith.cmpi ne, %1, %c0_i32_0 : i32
    scf.if %2 {
      %c0_32 = arith.constant 0 : index
      %c0_33 = arith.constant 0 : index
      %60 = vector.load %arg2[%c0_32, %c0_33] : memref<8x32xf32, #tpu.memory_space<vmem>>, vector<8x32xf32>
      %c0_34 = arith.constant 0 : index
      %c0_35 = arith.constant 0 : index
      %61 = vector.load %arg12[%c0_34, %c0_35] : memref<8x32xf32, #tpu.memory_space<vmem>>, vector<8x32xf32>
      tpu.vector_store %arg12[%c0_34, %c0_35], %60 {strides = array<i32>} : memref<8x32xf32, #tpu.memory_space<vmem>>, vector<8x32xf32>,
    } else {
    }
    %c0 = arith.constant 0 : index
    %c0_1 = arith.constant 0 : index
    %3 = vector.load %arg3[%c0, %c0_1] : memref<32x32xf32, #tpu.memory_space<vmem>>, vector<32x32xf32>
    %c0_2 = arith.constant 0 : index
    %c0_3 = arith.constant 0 : index
    %4 = vector.load %arg4[%c0_2, %c0_3] : memref<1x32xf32, #tpu.memory_space<vmem>>, vector<1x32xf32>
    %c0_4 = arith.constant 0 : index
    %c0_5 = arith.constant 0 : index
    %5 = vector.load %arg5[%c0_4, %c0_5] : memref<32x96xf32, #tpu.memory_space<vmem>>, vector<32x96xf32>
    %c0_6 = arith.constant 0 : index
    %c0_7 = arith.constant 0 : index
    %6 = vector.load %arg6[%c0_6, %c0_7] : memref<32x96xf32, #tpu.memory_space<vmem>>, vector<32x96xf32>
    %c0_8 = arith.constant 0 : index
    %c0_9 = arith.constant 0 : index
    %7 = vector.load %arg7[%c0_8, %c0_9] : memref<1x96xf32, #tpu.memory_space<vmem>>, vector<1x96xf32>
    %c0_10 = arith.constant 0 : index
    %c0_11 = arith.constant 0 : index
    %8 = vector.load %arg8[%c0_10, %c0_11] : memref<1x96xf32, #tpu.memory_space<vmem>>, vector<1x96xf32>
    %c0_12 = arith.constant 0 : index
    %c0_13 = arith.constant 0 : index
    %9 = vector.load %arg9[%c0_12, %c0_13] : memref<32x128xf32, #tpu.memory_space<vmem>>, vector<32x128xf32>
    %c0_14 = arith.constant 0 : index
    %c0_15 = arith.constant 0 : index
    %10 = vector.load %arg10[%c0_14, %c0_15] : memref<1x128xf32, #tpu.memory_space<vmem>>, vector<1x128xf32>
    %c0_16 = arith.constant 0 : index
    %c0_17 = arith.constant 0 : index
    %11 = vector.load %arg12[%c0_16, %c0_17] : memref<8x32xf32, #tpu.memory_space<vmem>>, vector<8x32xf32>
    %c0_i32_18 = arith.constant 0 : i32
    %12 = arith.index_cast %c0_i32_18 : i32 to index
    %c0_19 = arith.constant 0 : index
    %c0_20 = arith.constant 0 : index
    %13 = vector.load %arg1[%12, %c0_19, %c0_20] : memref<1x8x32xf32, #tpu.memory_space<vmem>>, vector<1x8x32xf32>
    %14 = vector.shape_cast %13 : vector<1x8x32xf32> to vector<8x32xf32>
    %cst = arith.constant dense<0.000000e+00> : vector<8x32xf32>
    %15 = tpu.matmul %14, %3, %cst {dimension_numbers = #tpu.dot_dimension_numbers<[1], [0], [0], [1], [0, 0, 1, 1], [], []>} : vector<8x32xf32>, vector<32x32xf32>, vector<8x32xf32> -> vector<8x32xf32>
    %16 = vector.broadcast %4 : vector<1x32xf32> to vector<8x32xf32>
    %17 = arith.addf %15, %16 : vector<8x32xf32>
    %cst_21 = arith.constant 0.000000e+00 : f32
    %18 = vector.broadcast %cst_21 : f32 to vector<8x32xf32>
    %19 = arith.maximumf %17, %18 : vector<8x32xf32>
    %cst_22 = arith.constant dense<0.000000e+00> : vector<8x96xf32>
    %20 = tpu.matmul %19, %5, %cst_22 {dimension_numbers = #tpu.dot_dimension_numbers<[1], [0], [0], [1], [0, 0, 1, 1], [], []>} : vector<8x32xf32>, vector<32x96xf32>, vector<8x96xf32> -> vector<8x96xf32>
    %21 = vector.broadcast %7 : vector<1x96xf32> to vector<8x96xf32>
    %22 = arith.addf %20, %21 : vector<8x96xf32>
    %cst_23 = arith.constant dense<0.000000e+00> : vector<8x96xf32>
    %23 = tpu.matmul %11, %6, %cst_23 {dimension_numbers = #tpu.dot_dimension_numbers<[1], [0], [0], [1], [0, 0, 1, 1], [], []>} : vector<8x32xf32>, vector<32x96xf32>, vector<8x96xf32> -> vector<8x96xf32>
    %24 = vector.broadcast %8 : vector<1x96xf32> to vector<8x96xf32>
    %25 = arith.addf %23, %24 : vector<8x96xf32>
    %26 = vector.extract_strided_slice %22 {offsets = [0, 0], sizes = [8, 32], strides = [1, 1]} : vector<8x96xf32> to vector<8x32xf32>
    %27 = vector.extract_strided_slice %25 {offsets = [0, 0], sizes = [8, 32], strides = [1, 1]} : vector<8x96xf32> to vector<8x32xf32>
    %28 = arith.addf %26, %27 : vector<8x32xf32>
    %29 = arith.negf %28 : vector<8x32xf32>
    %30 = math.exp %29 : vector<8x32xf32>
    %cst_24 = arith.constant 1.000000e+00 : f32
    %31 = vector.broadcast %cst_24 : f32 to vector<8x32xf32>
    %32 = arith.addf %31, %30 : vector<8x32xf32>
    %33 = arith.divf %31, %32 : vector<8x32xf32>
    %34 = vector.extract_strided_slice %22 {offsets = [0, 32], sizes = [8, 32], strides = [1, 1]} : vector<8x96xf32> to vector<8x32xf32>
    %35 = vector.extract_strided_slice %25 {offsets = [0, 32], sizes = [8, 32], strides = [1, 1]} : vector<8x96xf32> to vector<8x32xf32>
    %36 = arith.addf %34, %35 : vector<8x32xf32>
    %37 = arith.negf %36 : vector<8x32xf32>
    %38 = math.exp %37 : vector<8x32xf32>
    %cst_25 = arith.constant 1.000000e+00 : f32
    %39 = vector.broadcast %cst_25 : f32 to vector<8x32xf32>
    %40 = arith.addf %39, %38 : vector<8x32xf32>
    %41 = arith.divf %39, %40 : vector<8x32xf32>
    %42 = vector.extract_strided_slice %22 {offsets = [0, 64], sizes = [8, 32], strides = [1, 1]} : vector<8x96xf32> to vector<8x32xf32>
    %43 = vector.extract_strided_slice %25 {offsets = [0, 64], sizes = [8, 32], strides = [1, 1]} : vector<8x96xf32> to vector<8x32xf32>
    %44 = arith.mulf %33, %43 : vector<8x32xf32>
    %45 = arith.addf %42, %44 : vector<8x32xf32>
    %46 = math.tanh %45 : vector<8x32xf32>
    %cst_26 = arith.constant 1.000000e+00 : f32
    %47 = vector.broadcast %cst_26 : f32 to vector<8x32xf32>
    %48 = arith.subf %47, %41 : vector<8x32xf32>
    %49 = arith.mulf %48, %46 : vector<8x32xf32>
    %50 = arith.mulf %41, %11 : vector<8x32xf32>
    %51 = arith.addf %49, %50 : vector<8x32xf32>
    %cst_27 = arith.constant dense<0.000000e+00> : vector<8x128xf32>
    %52 = tpu.matmul %51, %9, %cst_27 {dimension_numbers = #tpu.dot_dimension_numbers<[1], [0], [0], [1], [0, 0, 1, 1], [], []>} : vector<8x32xf32>, vector<32x128xf32>, vector<8x128xf32> -> vector<8x128xf32>
    %53 = vector.broadcast %10 : vector<1x128xf32> to vector<8x128xf32>
    %54 = arith.addf %52, %53 : vector<8x128xf32>
    %55 = arith.index_cast %c0_i32_18 : i32 to index
    %c0_28 = arith.constant 0 : index
    %c0_29 = arith.constant 0 : index
    %56 = vector.load %arg11[%55, %c0_28, %c0_29] : memref<1x8x128xf32, #tpu.memory_space<vmem>>, vector<1x8x128xf32>
    %57 = vector.shape_cast %56 : vector<1x8x128xf32> to vector<8x128xf32>
    %58 = vector.shape_cast %54 : vector<8x128xf32> to vector<1x8x128xf32>
    tpu.vector_store %arg11[%55, %c0_28, %c0_29], %58 {strides = array<i32>} : memref<1x8x128xf32, #tpu.memory_space<vmem>>, vector<1x8x128xf32>,
    %c1_i32 = arith.constant 1 : i32
    %c0_30 = arith.constant 0 : index
    %c0_31 = arith.constant 0 : index
    %59 = vector.load %arg12[%c0_30, %c0_31] : memref<8x32xf32, #tpu.memory_space<vmem>>, vector<8x32xf32>
    tpu.vector_store %arg12[%c0_30, %c0_31], %51 {strides = array<i32>} : memref<8x32xf32, #tpu.memory_space<vmem>>, vector<8x32xf32>,
    return
  }
  func.func @transform_0(%arg0: i32) -> (i32, i32, i32) {
    %c0_i32 = arith.constant 0 : i32
    %c0_i32_0 = arith.constant 0 : i32
    %c0_i32_1 = arith.constant 0 : i32
    return %arg0, %c0_i32, %c0_i32_0 : i32, i32, i32
  }
  func.func @transform_1(%arg0: i32) -> (i32, i32) {
    %c0_i32 = arith.constant 0 : i32
    %c0_i32_0 = arith.constant 0 : i32
    %c0_i32_1 = arith.constant 0 : i32
    return %c0_i32, %c0_i32_0 : i32, i32
  }
  func.func @transform_2(%arg0: i32) -> (i32, i32) {
    %c0_i32 = arith.constant 0 : i32
    %c0_i32_0 = arith.constant 0 : i32
    %c0_i32_1 = arith.constant 0 : i32
    return %c0_i32, %c0_i32_0 : i32, i32
  }
  func.func @transform_3(%arg0: i32) -> (i32, i32) {
    %c0_i32 = arith.constant 0 : i32
    %c0_i32_0 = arith.constant 0 : i32
    %c0_i32_1 = arith.constant 0 : i32
    return %c0_i32, %c0_i32_0 : i32, i32
  }
  func.func @transform_4(%arg0: i32) -> (i32, i32) {
    %c0_i32 = arith.constant 0 : i32
    %c0_i32_0 = arith.constant 0 : i32
    %c0_i32_1 = arith.constant 0 : i32
    return %c0_i32, %c0_i32_0 : i32, i32
  }
  func.func @transform_5(%arg0: i32) -> (i32, i32) {
    %c0_i32 = arith.constant 0 : i32
    %c0_i32_0 = arith.constant 0 : i32
    %c0_i32_1 = arith.constant 0 : i32
    return %c0_i32, %c0_i32_0 : i32, i32
  }
  func.func @transform_6(%arg0: i32) -> (i32, i32) {
    %c0_i32 = arith.constant 0 : i32
    %c0_i32_0 = arith.constant 0 : i32
    %c0_i32_1 = arith.constant 0 : i32
    return %c0_i32, %c0_i32_0 : i32, i32
  }
  func.func @transform_7(%arg0: i32) -> (i32, i32) {
    %c0_i32 = arith.constant 0 : i32
    %c0_i32_0 = arith.constant 0 : i32
    %c0_i32_1 = arith.constant 0 : i32
    return %c0_i32, %c0_i32_0 : i32, i32
  }
  func.func @transform_8(%arg0: i32) -> (i32, i32) {
    %c0_i32 = arith.constant 0 : i32
    %c0_i32_0 = arith.constant 0 : i32
    %c0_i32_1 = arith.constant 0 : i32
    return %c0_i32, %c0_i32_0 : i32, i32
  }
  func.func @transform_9(%arg0: i32) -> (i32, i32) {
    %c0_i32 = arith.constant 0 : i32
    %c0_i32_0 = arith.constant 0 : i32
    %c0_i32_1 = arith.constant 0 : i32
    return %c0_i32, %c0_i32_0 : i32, i32
  }
  func.func @transform_10(%arg0: i32) -> (i32, i32, i32) {
    %c0_i32 = arith.constant 0 : i32
    %c0_i32_0 = arith.constant 0 : i32
    %c0_i32_1 = arith.constant 0 : i32
    return %arg0, %c0_i32, %c0_i32_0 : i32, i32, i32
  }
  func.func @transform_11(%arg0: i32) -> (i32, i32) {
    %c0_i32 = arith.constant 0 : i32
    %c0_i32_0 = arith.constant 0 : i32
    %c0_i32_1 = arith.constant 0 : i32
    return %c0_i32, %c0_i32_0 : i32, i32
  }
}

</mosaic_0001>

<bundles_post_ra>
// kernel: rnn_agent_forward.1
= control target key start
LH: loop header
LB: loop body
LE: loop exit
PB: predicated region body
PF: predicated region fallthrough
CT: control target
= control target key end

     0   :  { %v535_v0 = vmov 0.0|0.0   ;;  %vm536_vm0 = vmmov 0   ;;  %v537_v4 = vmov 0.0   ;;  %vm42_vm1 = vcmask 261120   ;;  %s539_s16 = smov 96   ;;  %s540_s17 = smov 32   ;;  %s697_s2 = inlined_call_operand.vmem [shape: f32[32,32], index: 2, kind: input, shape index: {}]   ;;  %s698_s1 = inlined_call_operand.vmem [shape: f32[8,32], index: 1, kind: input, shape index: {}, may-alias: {1,11}]   ;;  %s699_s4 = inlined_call_operand.vmem [shape: f32[32,96], index: 4, kind: input, shape index: {}]   ;;  %s700_s5 = inlined_call_operand.vmem [shape: f32[32,96], index: 5, kind: input, shape index: {}]   ;;  %s701_s11 = inlined_call_operand.vmem [shape: f32[8,32], index: 11, kind: output, shape index: {1}, may-alias: {1,11}]   ;;  %s702_s0 = inlined_call_operand.vmem [shape: f32[1,8,32], index: 0, kind: input, shape index: {}]   ;;  %s703_s3 = inlined_call_operand.vmem [shape: f32[1,32], index: 3, kind: input, shape index: {}]   ;;  %s704_s7 = inlined_call_operand.vmem [shape: f32[1,96], index: 7, kind: input, shape index: {}]   ;;  %s705_s6 = inlined_call_operand.vmem [shape: f32[1,96], index: 6, kind: input, shape index: {}]   ;;  %s706_s8 = inlined_call_operand.vmem [shape: f32[32,128], index: 8, kind: input, shape index: {}]   ;;  %s707_s9 = inlined_call_operand.vmem [shape: f32[1,128], index: 9, kind: input, shape index: {}]   ;;  %s708_s10 = inlined_call_operand.vmem [shape: f32[1,8,128], index: 10, kind: output, shape index: {0}]  }
   0x1   :  { %499 = vmatprep.subr.bf16.mxu0 %v535_v0  ;;  %v44_v1 = vld [vmem:[%s697_s2] sm:$0xff]  ;;  %v45_v2 = vld [vmem:[%s697_s2 + $0x8] sm:$0xff]  ;;  %v46_v3 = vld [vmem:[%s697_s2 + $0x10] sm:$0xff]  ;;  %463 = vmatprep.mubr.msk.f32.mxu0 %vm536_vm0, %v537_v4 }
   0x2   :  { %v500_v5 = vpack.c.bf16 %v45_v2, %v44_v1  ;;  %v47_v6 = vld [vmem:[%s697_s2 + $0x18] sm:$0xff]  ;;  %505 = vmatprep.subr.bf16.mxu1 %v535_v0  ;;  %474 = vmatprep.mubr.msk.f32.mxu1 %vm536_vm0, %v537_v4  ;;  %v41_v8 = vld [vmem:[%s698_s1] sm:$0xff]  ;;  %v50_v10 = vld [vmem:[%s699_s4 + $0x8] sm:$0xff] }
   0x3   :  { %v503_v7 = vpack.c.bf16 %v47_v6, %v46_v3  ;;  %v49_v9 = vld [vmem:[%s699_s4] sm:$0xff]  ;;  %v54_v12 = vld [vmem:[%s700_s5 + $0x8] sm:$0xff]  ;;  %43 = vst.msk [vmem:[%s701_s11] sm:$0xff] %vm42_vm1, %v41_v8  ;;  %v55_v16 = vld [vmem:[%s700_s5 + $0x10] sm:$0xff] }
   0x4   :  { %501 = vmatpush3.bf16.msra.mxu0 %v500_v5  ;;  %v53_v11 = vld [vmem:[%s700_s5] sm:$0xff]  ;;  %v506_v13 = vpack.c.bf16 %v50_v10, %v49_v9  ;;  %v56_v17 = vld [vmem:[%s700_s5 + $0x18] sm:$0xff]  ;;  %v51_v20 = vld [vmem:[%s699_s4 + $0x10] sm:$0xff] }
   0x5   :  { %502 = vmatprep.subr.bf16.mxu0 %v535_v0  ;;  %v65_v14 = vld [vmem:[%s702_s0] sm:$0xff]  ;;  %v512_v15 = vpack.c.bf16 %v54_v12, %v53_v11  ;;  %v515_v18 = vpack.c.bf16 %v56_v17, %v55_v16  ;;  %v52_v21 = vld [vmem:[%s699_s4 + $0x18] sm:$0xff]  ;;  %s538_s4 = smov 64   ;;  %v60_v46 = vld [vmem:[%s706_s8 + $0x8] sm:$0xff] }
   0x6   :  { %507 = vmatpush3.bf16.msra.mxu1 %v506_v13  ;;  %v509_v22 = vpack.c.bf16 %v52_v21, %v51_v20  ;;  %v426_v23 = vld [vmem:[%s703_s3] ss:$0 sm:$0xff]  ;;  %v61_v47 = vld [vmem:[%s706_s8 + $0x10] sm:$0xff]  ;;  %v62_v49 = vld [vmem:[%s706_s8 + $0x18] sm:$0xff] }
   0x7   :  { %508 = vmatprep.subr.bf16.mxu1 %v535_v0  ;;  %v430_v28 = vld [vmem:[%s704_s7] ss:$0 sm:$0xff]  ;;  %v521_v51 = vpack.c.bf16 %v62_v49, %v61_v47 }
   0x8   :  { %504 = vmatpush3.bf16.msra.mxu0 %v503_v7  ;;  %v428_v32 = vld [vmem:[%s705_s6] ss:$0 sm:$0xff] }
   0x9   :  { %511 = vmatprep.subr.bf16.mxu0 %v535_v0  ;;  %v59_v45 = vld [vmem:[%s706_s8] sm:$0xff] }
   0xa   :  { %v64_v19 = vld [vmem:[%s701_s11] sm:$0xff]  ;;  %510 = vmatpush3.bf16.msra.mxu1 %v509_v22  ;;  %v518_v48 = vpack.c.bf16 %v60_v46, %v59_v45 }
   0xb   :  { %464 = vmatmul.mubr.msk.f32.vlgmr.msra.gmra.mrb[0].mxu0 %vm42_vm1, %v65_v14  ;;  %517 = vmatprep.subr.bf16.mxu1 %v535_v0  ;;  %v433_v59 = vld [vmem:[%s707_s9] ss:$0 sm:$0xff] }
   0xc   :  { %513 = vmatpush3.bf16.msra.mxu0 %v512_v15  ;;  %485 = vmatprep.mubr.msk.f32.mxu0 %vm536_vm0, %v537_v4 }
   0xd   :  { %514 = vmatprep.subr.bf16.mxu0 %v535_v0 }
  0x10   :  { %516 = vmatpush3.bf16.msra.mxu0 %v515_v18 }
  0x13   :  { %486 = vmatmul.mubr.msk.f32.vlgmr.msra.gmra.mrb[2].mxu0 %vm42_vm1, %v64_v19 }
  0xde   :  { %v142_v24 = vpop.f32.mrb[0].mxu0 }
  0xdf   :  { %v143_v25 = vadd.f32 %v426_v23, %v142_v24  ;;  %v465_v26 = vpop.f32.mrb[1].mxu0 }
  0xe1   :  { %v146_v27 = vmax.f32 %v143_v25, 0.0 }
  0xe3   :  { %475 = vmatmul.mubr.msk.f32.vlgmr.msra.gmra.mrb[0].mxu1 %vm42_vm1, %v146_v27 }
  0xe4   :  { %496 = vmatprep.mubr.msk.f32.mxu1 %vm536_vm0, %v537_v4  ;;  %519 = vmatpush3.bf16.msra.mxu1 %v518_v48 }
  0xe5   :  { %520 = vmatprep.subr.bf16.mxu1 %v535_v0 }
  0xe6   :  { %v301_v29 = vpop.f32.mrb[2].mxu0 }
  0xe7   :  { %v302_v30 = vadd.f32 %v430_v28, %v301_v29  ;;  %v487_v31 = vpop.f32.mrb[3].mxu0 }
  0xe8   :  { %522 = vmatpush3.bf16.msra.mxu1 %v521_v51 }
  0xe9   :  { %313 = vrot.lane.b32.xlu0 %v302_v30, %s538_s4 }
 0x15b   :  { %v314_v40 = vpop.permute.xlu0 %313 }
 0x1b6   :  { %v222_v33 = vpop.f32.mrb[0].mxu1 }
 0x1b7   :  { %v223_v34 = vadd.f32 %v428_v32, %v222_v33  ;;  %v476_v35 = vpop.f32.mrb[1].mxu1 }
 0x1b9   :  { %v305_v36 = vadd.f32 %v302_v30, %v223_v34 }
 0x1bb   :  { %v432_v37 = vmul.f32 -1.442695, %v305_v36 }
 0x1bd   :  { %529 = vpow2.f32 %v432_v37 }
 0x1c7   :  { %v530_v38 = vpop.eup %529 }
 0x1c8   :  { %v309_v39 = vadd.f32 1.0, %v530_v38 }
 0x1ca   :  { %531 = vrcp.f32 %v309_v39 }
 0x1d4   :  { %v532_v41 = vpop.eup %531 }
 0x1d5   :  { %v316_v42 = vmul.f32 %v532_v41, %v314_v40  ;;  %v323_v53 = vsub.f32 1.0, %v532_v41 }
 0x1d7   :  { %318 = vrot.lane.b32.xlu0 %v316_v42, %s538_s4 }
 0x249   :  { %v319_v43 = vpop.permute.xlu0 %318 }
 0x24a   :  { %v321_v44 = vadd.f32 %v319_v43, %v223_v34 }
 0x24c   :  { %533 = vtanh.f32 %v321_v44 }
 0x256   :  { %v534_v50 = vpop.eup %533 }
 0x257   :  { %325 = vrot.lane.b32.xlu1 %v534_v50, %s539_s16 }
 0x25b   :  { %329 = vrot.lane.b32.xlu1 %v64_v19, %s540_s17 }
 0x2c9   :  { %v326_v52 = vpop.permute.xlu1 %325 }
 0x2ca   :  { %v328_v55 = vmul.f32 %v326_v52, %v323_v53 }
 0x2cd   :  { %v330_v54 = vpop.permute.xlu1 %329 }
 0x2ce   :  { %v332_v56 = vmul.f32 %v532_v41, %v330_v54 }
 0x2d0   :  { %v333_v57 = vadd.f32 %v332_v56, %v328_v55 }
 0x2d2   :  { %341 = vrot.lane.b32.xlu0 %v333_v57, %s539_s16 }
 0x344   :  { %v342_v58 = vpop.permute.xlu0 %341 }
 0x345   :  { %417 = vst.msk [vmem:[%s701_s11] sm:$0xff] %vm42_vm1, %v342_v58  ;;  %497 = vmatmul.mubr.msk.f32.vlgmr.msra.gmra.mrb[2].mxu1 %vm42_vm1, %v342_v58 }
 0x418   :  { %v411_v60 = vpop.f32.mrb[2].mxu1 }
 0x419   :  { %v412_v61 = vadd.f32 %v433_v59, %v411_v60  ;;  %v498_v62 = vpop.f32.mrb[3].mxu1 }
 0x41b   :  { %415 = vst [vmem:[%s708_s10] sm:$0xff] %v412_v61 }

</bundles_post_ra>
